<compile_context>
chip_gen: v5e
topology: v5e:2x2
jax: 0.10.0
libtpu: 0.0.40
codegen_flags: <defaults>
</compile_context>

<pallas_src>
import jax
import jax.numpy as jnp
from jax.experimental import pallas as pl
from jax.experimental.pallas import tpu as pltpu

# Deterministic "parameters" (would come from SceneCollider.__init__ kwargs:
# scene_box aabb + near_plane). Baked in-script, no checkpoint load.
AABB_MIN = (-1.0, -1.0, -1.0)
AABB_MAX = (1.0, 1.0, 1.0)
NEAR_PLANE = 0.05
EPS = 1e-6

LANES = 128                      # TPU lane width; ray n -> (n // 128, n % 128)
MIN_TILE_ROWS = 256              # DMA-efficiency floor (~0.75 MiB input block)
MAX_TILE_ROWS = 2048             # 6 MiB input block; ~16 MiB double-buffered
VMEM_LIMIT_BYTES = 32 * 1024 * 1024   # explicit: covers v5e's 16 MiB default,
                                      # leaves headroom on v7x's 64 MiB per TC
PALLAS_MIN_RAYS = 65536          # below this the fused pure-JAX path wins


def _aabb_collider_kernel(rays_ref, nears_ref, fars_ref):
    """rays_ref: (6, tile_rows, 128) [ox,oy,oz,dx,dy,dz]; outputs: (tile_rows, 128)."""
    ox, oy, oz = rays_ref[0], rays_ref[1], rays_ref[2]
    dx, dy, dz = rays_ref[3], rays_ref[4], rays_ref[5]

    # Exact divide kept (matches nerfstudio's 1/(d + 1e-6)); this kernel is
    # HBM-bound on v5e/v6e/v7x so the VALU cost is hidden under the DMA.
    inv_dx = 1.0 / (dx + EPS)
    inv_dy = 1.0 / (dy + EPS)
    inv_dz = 1.0 / (dz + EPS)

    t1 = (AABB_MIN[0] - ox) * inv_dx
    t2 = (AABB_MAX[0] - ox) * inv_dx
    t3 = (AABB_MIN[1] - oy) * inv_dy
    t4 = (AABB_MAX[1] - oy) * inv_dy
    t5 = (AABB_MIN[2] - oz) * inv_dz
    t6 = (AABB_MAX[2] - oz) * inv_dz

    nears = jnp.maximum(
        jnp.maximum(jnp.minimum(t1, t2), jnp.minimum(t3, t4)),
        jnp.minimum(t5, t6),
    )
    fars = jnp.minimum(
        jnp.minimum(jnp.maximum(t1, t2), jnp.maximum(t3, t4)),
        jnp.maximum(t5, t6),
    )

    nears = jnp.maximum(nears, NEAR_PLANE)   # clamp to near plane
    fars = jnp.maximum(fars, nears + EPS)    # keep far >= near + eps

    nears_ref[...] = nears
    fars_ref[...] = fars


def _round_up(x, m):
    return ((x + m - 1) // m) * m


def _choose_tile_rows(rows):
    """>= 4 grid steps (>= 2 per v7x TensorCore), 256-row floor, 2048-row cap."""
    target = _round_up(pl.cdiv(rows, 4), 8)
    tile_rows = min(MAX_TILE_ROWS, max(MIN_TILE_ROWS, target))
    tile_rows = min(tile_rows, _round_up(rows, 8))   # never bigger than problem
    return max(8, tile_rows)


def _run_pallas(rays_soa, tile_rows=None):
    """rays_soa: (6, rows, 128) f32 -> nears, fars each (rows, 128) f32.

    No padding / no output slicing: grid = cdiv(rows, tile_rows); the ragged
    last block is handled by Pallas (OOB block writes dropped, garbage reads
    only affect rows that are never written back).
    """
    rows = rays_soa.shape[1]
    if tile_rows is None:
        tile_rows = _choose_tile_rows(rows)
    num_tiles = pl.cdiv(rows, tile_rows)

    nears, fars = pl.pallas_call(
        _aabb_collider_kernel,
        out_shape=(
            jax.ShapeDtypeStruct((rows, LANES), jnp.float32),
            jax.ShapeDtypeStruct((rows, LANES), jnp.float32),
        ),
        grid=(num_tiles,),
        in_specs=[pl.BlockSpec((6, tile_rows, LANES), lambda i: (0, i, 0))],
        out_specs=(
            pl.BlockSpec((tile_rows, LANES), lambda i: (i, 0)),
            pl.BlockSpec((tile_rows, LANES), lambda i: (i, 0)),
        ),
        compiler_params=pltpu.CompilerParams(
            dimension_semantics=("parallel",),
            vmem_limit_bytes=VMEM_LIMIT_BYTES,
        ),
    )(rays_soa)
    return nears, fars


# ----------------------------------------------------------------------------
# Pure-JAX fused references / fallbacks (mirror the PyTorch AABB math exactly)
# ----------------------------------------------------------------------------
def _nears_fars_ref(origins, directions):
    """(N, 3) layout reference."""
    aabb_min = jnp.array(AABB_MIN, jnp.float32)
    aabb_max = jnp.array(AABB_MAX, jnp.float32)
    dfrac = 1.0 / (directions + EPS)
    t_lo = (aabb_min - origins) * dfrac
    t_hi = (aabb_max - origins) * dfrac
    nears = jnp.max(jnp.minimum(t_lo, t_hi), axis=-1, keepdims=True)
    fars = jnp.min(jnp.maximum(t_lo, t_hi), axis=-1, keepdims=True)
    nears = jnp.maximum(nears, NEAR_PLANE)
    fars = jnp.maximum(fars, nears + EPS)
    return nears, fars


def _nears_fars_soa_ref(rays_soa):
    """(6, rows, 128) SoA layout reference / small-input fallback."""
    o = rays_soa[0:3]
    d = rays_soa[3:6]
    aabb_min = jnp.array(AABB_MIN, jnp.float32).reshape(3, 1, 1)
    aabb_max = jnp.array(AABB_MAX, jnp.float32).reshape(3, 1, 1)
    inv = 1.0 / (d + EPS)
    t_lo = (aabb_min - o) * inv
    t_hi = (aabb_max - o) * inv
    nears = jnp.max(jnp.minimum(t_lo, t_hi), axis=0)
    fars = jnp.min(jnp.maximum(t_lo, t_hi), axis=0)
    nears = jnp.maximum(nears, NEAR_PLANE)
    fars = jnp.maximum(fars, nears + EPS)
    return nears, fars


# ----------------------------------------------------------------------------
# Public API
# ----------------------------------------------------------------------------
def set_nears_and_fars_soa(rays_soa, *, use_pallas=None, tile_rows=None):
    """Fast path. rays_soa: (6, rows, 128) component-major [ox,oy,oz,dx,dy,dz].

    Returns nears, fars each shaped (rows, 128); ray n lives at
    (n // 128, n % 128), so .reshape(-1, 1) recovers the (N, 1) RayBundle
    convention for free.
    """
    rays_soa = jnp.asarray(rays_soa, jnp.float32)
    rows = rays_soa.shape[1]
    if use_pallas is None:
        use_pallas = rows * LANES >= PALLAS_MIN_RAYS
    if not use_pallas:
        return _nears_fars_soa_ref(rays_soa)
    return _run_pallas(rays_soa, tile_rows=tile_rows)


def set_nears_and_fars(origins, directions, *, use_pallas=False):
    """Compat wrapper for the PyTorch RayBundle (N, 3) convention.

    Defaults to the fused pure-JAX path: the (N,3)->SoA repack moves ~3x the
    kernel's own HBM bytes, so Pallas only pays off when rays are generated in
    the SoA layout (use set_nears_and_fars_soa for peak throughput).
    """
    origins = jnp.asarray(origins, jnp.float32)
    directions = jnp.asarray(directions, jnp.float32)
    n = origins.shape[0]
    if not use_pallas:
        return _nears_fars_ref(origins, directions)

    rays = jnp.concatenate([origins, directions], axis=-1)        # (N, 6)
    pad_n = _round_up(max(n, 1), 8 * LANES) - n                   # tiny tail pad
    if pad_n:
        # Padded rays use origin=dir=(1,1,1): finite, harmless, discarded below.
        rays = jnp.pad(rays, ((0, pad_n), (0, 0)), constant_values=1.0)
    rows = rays.shape[0] // LANES
    rays_soa = rays.reshape(rows, LANES, 6).transpose(2, 0, 1)    # (6, rows, 128)

    nears_r, fars_r = _run_pallas(rays_soa)
    return nears_r.reshape(-1, 1)[:n], fars_r.reshape(-1, 1)[:n]


def scene_collider_forward_soa(rays_soa, nears=None, fars=None, **kw):
    """SceneCollider.forward on the SoA layout: pass through if already set."""
    if nears is not None and fars is not None:
        return nears, fars
    return set_nears_and_fars_soa(rays_soa, **kw)


def scene_collider_forward(origins, directions, nears=None, fars=None, **kw):
    """SceneCollider.forward on the (N, 3) layout: pass through if already set."""
    if nears is not None and fars is not None:
        return nears, fars
    return set_nears_and_fars(origins, directions, **kw)


# TODO(synk): base-class set_nears_and_fars is abstract (NotImplementedError);
# realized here with the canonical AABB collider semantics.

if __name__ == "__main__":
    key = jax.random.PRNGKey(0)
    k_o, k_d = jax.random.split(key)

    ROWS = 72                      # 72 rows x 128 lanes = 9216 rays (small demo)
    N = ROWS * LANES

    # Generate rays directly in the component-major SoA layout so the kernel
    # path needs no host-side transposes.
    o_soa = 0.1 * jax.random.normal(k_o, (3, ROWS, LANES), dtype=jnp.float32)
    d_soa = jax.random.normal(k_d, (3, ROWS, LANES), dtype=jnp.float32)
    d_soa = d_soa / jnp.linalg.norm(d_soa, axis=0, keepdims=True)
    rays_soa = jnp.concatenate([o_soa, d_soa], axis=0)            # (6, 72, 128)

    # AoS view of the same rays, for the reference / compat path.
    origins = o_soa.reshape(3, N).T        # (N, 3)
    directions = d_soa.reshape(3, N).T     # (N, 3)
    ref_nears, ref_fars = _nears_fars_ref(origins, directions)

    # Case 1: nears/fars already set -> pass through (base-class forward gate).
    preset_nears = jnp.full((N, 1), 0.1, jnp.float32)
    preset_fars = jnp.full((N, 1), 4.0, jnp.float32)
    n_pass, f_pass = scene_collider_forward_soa(rays_soa, preset_nears, preset_fars)
    assert n_pass is preset_nears and f_pass is preset_fars

    # Case 2: Pallas kernel (SoA fast path), forced on the small demo size with
    # a tile that does NOT divide rows (72 % 32 != 0) -> exercises the cdiv
    # grid + ragged last block with no explicit padding or output slicing.
    nears_r, fars_r = scene_collider_forward_soa(
        rays_soa, use_pallas=True, tile_rows=32)
    jax.block_until_ready((nears_r, fars_r))
    assert nears_r.shape == (ROWS, LANES) and fars_r.shape == (ROWS, LANES)
    assert jnp.allclose(nears_r.reshape(N, 1), ref_nears, rtol=1e-5, atol=1e-5)
    assert jnp.allclose(fars_r.reshape(N, 1), ref_fars, rtol=1e-5, atol=1e-5)

    # Case 2b: Pallas kernel with the automatic tile heuristic.
    nears_a, fars_a = set_nears_and_fars_soa(rays_soa, use_pallas=True)
    jax.block_until_ready((nears_a, fars_a))
    assert jnp.allclose(nears_a.reshape(N, 1), ref_nears, rtol=1e-5, atol=1e-5)
    assert jnp.allclose(fars_a.reshape(N, 1), ref_fars, rtol=1e-5, atol=1e-5)

    # Case 3: (N, 3) compat wrapper, default -> fused pure-JAX path.
    nears_c, fars_c = scene_collider_forward(origins, directions)
    assert jnp.allclose(nears_c, ref_nears, rtol=1e-5, atol=1e-5)
    assert jnp.allclose(fars_c, ref_fars, rtol=1e-5, atol=1e-5)

    # Case 4: (N, 3) compat wrapper forced through Pallas with a ragged N
    # (exercises the minimal tail pad + SoA repack + lane/row handling).
    n_small = 300
    nears_p, fars_p = set_nears_and_fars(
        origins[:n_small], directions[:n_small], use_pallas=True)
    jax.block_until_ready((nears_p, fars_p))
    assert nears_p.shape == (n_small, 1)
    assert jnp.allclose(nears_p, ref_nears[:n_small], rtol=1e-5, atol=1e-5)
    assert jnp.allclose(fars_p, ref_fars[:n_small], rtol=1e-5, atol=1e-5)

    print("KERNEL_OK")
</pallas_src>

<mosaic_0001>
module attributes {stable_mosaic.version = 11 : i64} {
  func.func @_aabb_collider_kernel(%arg0: i32, %arg1: memref<6x32x128xf32, #tpu.memory_space<vmem>>, %arg2: memref<32x128xf32, #tpu.memory_space<vmem>>, %arg3: memref<32x128xf32, #tpu.memory_space<vmem>>) attributes {dimension_semantics = [#tpu.dimension_semantics<parallel>], iteration_bounds = array<i64: 3>, scalar_prefetch = 0 : i64, scratch_operands = 0 : i64, tpu.core_type = #tpu.core_type<tc>, window_params = [{transform_indices = @transform_0, window_bounds = array<i64: 6, 32, 128>}, {transform_indices = @transform_1, window_bounds = array<i64: 32, 128>}, {transform_indices = @transform_2, window_bounds = array<i64: 32, 128>}]} {
    %c0 = arith.constant 0 : index
    %c0_0 = arith.constant 0 : index
    %c0_1 = arith.constant 0 : index
    %0 = vector.load %arg1[%c0, %c0_0, %c0_1] : memref<6x32x128xf32, #tpu.memory_space<vmem>>, vector<1x32x128xf32>
    %1 = vector.shape_cast %0 : vector<1x32x128xf32> to vector<32x128xf32>
    %c1 = arith.constant 1 : index
    %c0_2 = arith.constant 0 : index
    %c0_3 = arith.constant 0 : index
    %2 = vector.load %arg1[%c1, %c0_2, %c0_3] : memref<6x32x128xf32, #tpu.memory_space<vmem>>, vector<1x32x128xf32>
    %3 = vector.shape_cast %2 : vector<1x32x128xf32> to vector<32x128xf32>
    %c2 = arith.constant 2 : index
    %c0_4 = arith.constant 0 : index
    %c0_5 = arith.constant 0 : index
    %4 = vector.load %arg1[%c2, %c0_4, %c0_5] : memref<6x32x128xf32, #tpu.memory_space<vmem>>, vector<1x32x128xf32>
    %5 = vector.shape_cast %4 : vector<1x32x128xf32> to vector<32x128xf32>
    %c3 = arith.constant 3 : index
    %c0_6 = arith.constant 0 : index
    %c0_7 = arith.constant 0 : index
    %6 = vector.load %arg1[%c3, %c0_6, %c0_7] : memref<6x32x128xf32, #tpu.memory_space<vmem>>, vector<1x32x128xf32>
    %7 = vector.shape_cast %6 : vector<1x32x128xf32> to vector<32x128xf32>
    %c4 = arith.constant 4 : index
    %c0_8 = arith.constant 0 : index
    %c0_9 = arith.constant 0 : index
    %8 = vector.load %arg1[%c4, %c0_8, %c0_9] : memref<6x32x128xf32, #tpu.memory_space<vmem>>, vector<1x32x128xf32>
    %9 = vector.shape_cast %8 : vector<1x32x128xf32> to vector<32x128xf32>
    %c5 = arith.constant 5 : index
    %c0_10 = arith.constant 0 : index
    %c0_11 = arith.constant 0 : index
    %10 = vector.load %arg1[%c5, %c0_10, %c0_11] : memref<6x32x128xf32, #tpu.memory_space<vmem>>, vector<1x32x128xf32>
    %11 = vector.shape_cast %10 : vector<1x32x128xf32> to vector<32x128xf32>
    %cst = arith.constant 9.99999997E-7 : f32
    %12 = vector.broadcast %cst : f32 to vector<32x128xf32>
    %13 = arith.addf %7, %12 : vector<32x128xf32>
    %cst_12 = arith.constant 1.000000e+00 : f32
    %14 = vector.broadcast %cst_12 : f32 to vector<32x128xf32>
    %15 = arith.divf %14, %13 : vector<32x128xf32>
    %cst_13 = arith.constant 9.99999997E-7 : f32
    %16 = vector.broadcast %cst_13 : f32 to vector<32x128xf32>
    %17 = arith.addf %9, %16 : vector<32x128xf32>
    %cst_14 = arith.constant 1.000000e+00 : f32
    %18 = vector.broadcast %cst_14 : f32 to vector<32x128xf32>
    %19 = arith.divf %18, %17 : vector<32x128xf32>
    %cst_15 = arith.constant 9.99999997E-7 : f32
    %20 = vector.broadcast %cst_15 : f32 to vector<32x128xf32>
    %21 = arith.addf %11, %20 : vector<32x128xf32>
    %cst_16 = arith.constant 1.000000e+00 : f32
    %22 = vector.broadcast %cst_16 : f32 to vector<32x128xf32>
    %23 = arith.divf %22, %21 : vector<32x128xf32>
    %cst_17 = arith.constant -1.000000e+00 : f32
    %24 = vector.broadcast %cst_17 : f32 to vector<32x128xf32>
    %25 = arith.subf %24, %1 : vector<32x128xf32>
    %26 = arith.mulf %25, %15 : vector<32x128xf32>
    %cst_18 = arith.constant 1.000000e+00 : f32
    %27 = vector.broadcast %cst_18 : f32 to vector<32x128xf32>
    %28 = arith.subf %27, %1 : vector<32x128xf32>
    %29 = arith.mulf %28, %15 : vector<32x128xf32>
    %cst_19 = arith.constant -1.000000e+00 : f32
    %30 = vector.broadcast %cst_19 : f32 to vector<32x128xf32>
    %31 = arith.subf %30, %3 : vector<32x128xf32>
    %32 = arith.mulf %31, %19 : vector<32x128xf32>
    %cst_20 = arith.constant 1.000000e+00 : f32
    %33 = vector.broadcast %cst_20 : f32 to vector<32x128xf32>
    %34 = arith.subf %33, %3 : vector<32x128xf32>
    %35 = arith.mulf %34, %19 : vector<32x128xf32>
    %cst_21 = arith.constant -1.000000e+00 : f32
    %36 = vector.broadcast %cst_21 : f32 to vector<32x128xf32>
    %37 = arith.subf %36, %5 : vector<32x128xf32>
    %38 = arith.mulf %37, %23 : vector<32x128xf32>
    %cst_22 = arith.constant 1.000000e+00 : f32
    %39 = vector.broadcast %cst_22 : f32 to vector<32x128xf32>
    %40 = arith.subf %39, %5 : vector<32x128xf32>
    %41 = arith.mulf %40, %23 : vector<32x128xf32>
    %42 = arith.minimumf %26, %29 : vector<32x128xf32>
    %43 = arith.minimumf %32, %35 : vector<32x128xf32>
    %44 = arith.maximumf %42, %43 : vector<32x128xf32>
    %45 = arith.minimumf %38, %41 : vector<32x128xf32>
    %46 = arith.maximumf %44, %45 : vector<32x128xf32>
    %47 = arith.maximumf %26, %29 : vector<32x128xf32>
    %48 = arith.maximumf %32, %35 : vector<32x128xf32>
    %49 = arith.minimumf %47, %48 : vector<32x128xf32>
    %50 = arith.maximumf %38, %41 : vector<32x128xf32>
    %51 = arith.minimumf %49, %50 : vector<32x128xf32>
    %cst_23 = arith.constant 5.000000e-02 : f32
    %52 = vector.broadcast %cst_23 : f32 to vector<32x128xf32>
    %53 = arith.maximumf %46, %52 : vector<32x128xf32>
    %cst_24 = arith.constant 9.99999997E-7 : f32
    %54 = vector.broadcast %cst_24 : f32 to vector<32x128xf32>
    %55 = arith.addf %53, %54 : vector<32x128xf32>
    %56 = arith.maximumf %51, %55 : vector<32x128xf32>
    %c0_25 = arith.constant 0 : index
    %c0_26 = arith.constant 0 : index
    %57 = vector.load %arg2[%c0_25, %c0_26] : memref<32x128xf32, #tpu.memory_space<vmem>>, vector<32x128xf32>
    tpu.vector_store %arg2[%c0_25, %c0_26], %53 {strides = array<i32>} : memref<32x128xf32, #tpu.memory_space<vmem>>, vector<32x128xf32>,
    %c0_27 = arith.constant 0 : index
    %c0_28 = arith.constant 0 : index
    %58 = vector.load %arg3[%c0_27, %c0_28] : memref<32x128xf32, #tpu.memory_space<vmem>>, vector<32x128xf32>
    tpu.vector_store %arg3[%c0_27, %c0_28], %56 {strides = array<i32>} : memref<32x128xf32, #tpu.memory_space<vmem>>, vector<32x128xf32>,
    return
  }
  func.func @transform_0(%arg0: i32) -> (i32, i32, i32) {
    %c0_i32 = arith.constant 0 : i32
    %c0_i32_0 = arith.constant 0 : i32
    %c0_i32_1 = arith.constant 0 : i32
    return %c0_i32, %arg0, %c0_i32_0 : i32, i32, i32
  }
  func.func @transform_1(%arg0: i32) -> (i32, i32) {
    %c0_i32 = arith.constant 0 : i32
    %c0_i32_0 = arith.constant 0 : i32
    return %arg0, %c0_i32 : i32, i32
  }
  func.func @transform_2(%arg0: i32) -> (i32, i32) {
    %c0_i32 = arith.constant 0 : i32
    %c0_i32_0 = arith.constant 0 : i32
    return %arg0, %c0_i32 : i32, i32
  }
}

</mosaic_0001>

<bundles_post_ra>
// kernel: tpu_custom_call.1
= control target key start
LH: loop header
LB: loop body
LE: loop exit
PB: predicated region body
PF: predicated region fallthrough
CT: control target
= control target key end

     0   :  { %8 = vsyncpa [#allocation3], 0  ;;  %s1609_s0 = inlined_call_operand.hbm [shape: f32[6,72,128], index: 0, kind: input, shape index: {}]   ;;  %s1610_s1 = inlined_call_operand.hbm [shape: f32[72,128], index: 1, kind: output, shape index: {0}]   ;;  %s1611_s2 = inlined_call_operand.hbm [shape: f32[72,128], index: 2, kind: output, shape index: {1}]  }
   0x1   :  { %10 = vsyncpa [#allocation3 + $0x1], 0 }
   0x2   :  { %11 = vsyncpa [#allocation4], 0 }
   0x3   :  { %13 = vsyncpa [#allocation4 + $0x1], 0 }
   0x4   :  { %14 = vsyncpa [#allocation7], 0 }
   0x5   :  { %16 = vsyncpa [#allocation7 + $0x1], 0  ;;  %s989_s9 = smov 0   ;;  %s991_s10 = smov 0  }
   0x6   :  { %s993_s11 = smov 0   ;;  %s995_s12 = smov 0  }
   0x7 LB: > { %s1010_s13 = sadd.s32 4294967295, %s961_s12   ;;  %s710_s14 = sadd.s32 4294967294, %s961_s12   ;;  %s961_s12 = sphi %s995_s12, %s1671_s12   ;;  %s957_s11 = sphi %s993_s11, %s1670_s11   ;;  %s953_s10 = sphi %s991_s10, %s1669_s10   ;;  %s949_s9 = sphi %s989_s9, %s1668_s9  }
   0x8   : > { %s1014_s15 = sadd.s32 1, %s961_s12   ;;  %s29_s16 = sadd.s32 1, %s957_s11 }
   0x9   : > { %s26_s17 = ssub.s32 %s961_s12, %s1014_s15  ;;  %p36_p0 = scmp.ne.s32.totalorder %s957_s11, %s953_s10 }
   0xa   : > { %p27_p1 = scmp.eq.s32.totalorder %s26_s17, 0  ;;  %p37_p2 = scmp.eq.s32.totalorder %s961_s12, 0 }
   0xb   : > { %p42_p3 = scmp.ne.s32.totalorder %s953_s10, %s949_s9  ;;  %p43_p4 = scmp.eq.s32.totalorder %s1010_s13, 0 }
   0xc   : > { %s1026_s18 = scalar_select %p27_p1, %s957_s11, %s29_s16  }
   0xd   : > { %p38_p5 = por %p37_p2, %p36_p0  ;;  %p1028_p6 = por %p43_p4, %p42_p3 }
   0xe   : > { %p66_p7 = scmp.eq.s32.totalorder %s1010_s13, 2  ;;  %p72_p8 = scmp.eq.s32.totalorder %s710_s14, 2 }
   0xf   : > { %p712_p11 = scmp.ge.s32.totalorder %s961_s12, 3 }
  0x10   : > { %p1033_p9 = por %p66_p7, %p36_p0  ;;  %p1037_p10 = por %p72_p8, %p42_p3 }
  0x11   : > { %114 = sbr.rel (%p712_p11) target bundleno = 47 (0x2f), region = 16 }
  0x16   : > { %117 = sbr.rel (!%p38_p5) target bundleno = 47 (0x2f), region = 20 }
  0x1b   : > { %s118_s22 = sand.u32 1, %s957_s11   ;;  %s713_s23 = sshll.u32 %s961_s12, 2 }
  0x1c   : > { %s763_s24 = smul.u32 192, %s118_s22  ;;  %s124_s25 = ssub.s32 9, %s713_s23 }
  0x1d   : > { %p125_p12 = scmp.lt.s32.totalorder %s124_s25, 4  ;;  %s1047_s29 = scalar_lea.sflag [#allocation3], %s118_s22 }
  0x1e   : > { %s122_s30 = scalar_lea.vmem [#allocation2], %s763_s24 }
  0x1f   : > { %s1673_s25 = smov (!%p125_p12, %s124_s25), 4 }
  0x20   : > { %s127_s26 = smul.u32 48, %s1673_s25 }
  0x22   : > { %s128_s27 = ssub.s32 192, %s127_s26 }
  0x23   : > { %s129_s28 = sshll.u32 %s128_s27, 4 }
  0x24   : > { %130 = vsyncadd %s1047_s29, %s129_s28  ;;  %p1050_p13 = scmp.ne.s32.totalorder %s127_s26, 0  ;;  %s760_s4 = sshll.u32 %s961_s12, 5 }
  0x25   : > { %s133_s7 = scalar_lea.hbm %s1609_s0, %s760_s4  ;;  %s140_s8 = sld [smem:[#allocation0]]  }
  0x26   : > { %s148_s14 = sshll.u32 %s133_s7, 4  ;;  %s150_s16 = sshll.u32 %s122_s30, 4  ;;  %s149_s14 = int_to_ptr.hbm [resolvable:$true] %s148_s14  ;;  %s151_s16 = int_to_ptr.vmem [resolvable:$true] %s150_s16 }
  0x27   : > { %s720_s17 = smul.u32 768, %s1673_s25  ;;  %s963_s22 = smov 1152  }
  0x28   : > { %157 = sst [smem:[#allocation9]] %s963_s22  ;;  %s964_s23 = smov 512  }
  0x29   : > { %159 = sst [smem:[#allocation9 + $0x1]] %s964_s23  ;;  %s965_s27 = smov 128  }
  0x2a   : > { %161 = sst [smem:[#allocation9 + $0x2]] %s1673_s25  ;;  %s966_s28 = smov 8  }
  0x2b   : > { %s718_s24 = sshll.u32 %s140_s8, 26  ;;  %163 = sst [smem:[#allocation9 + $0x3]] %s965_s27 }
  0x2c   : > { %s719_s26 = sadd.s32 134217728, %s718_s24  ;;  %165 = sst [smem:[#allocation9 + $0x4]] %s965_s27 }
  0x2d   : > { %167 = sst [smem:[#allocation9 + $0x5]] %s966_s28  ;;  %s967_s4 = smov [#allocation8]  }
  0x2e   : > { %169 = dma.general (%p1050_p13), %s149_s14, %s720_s17, %s151_s16, %s1047_s29, %s967_s4, [#allocation9], %s719_s26, 0  }
  0x2f PF: > { %p721_p0 = scmp.ge.s32.totalorder %s961_s12, 1  ;;  %p171_p1 = scmp.lt.s32.totalorder %s961_s12, 4 }
  0x31   : > { %p172_p2 = pnand %p721_p0, %p171_p1 }
  0x32   : > { %s1066_s25 = sand.u32 (!%p172_p2), 1, %s953_s10  }
  0x33   : > { %175 = sbr.rel (%p172_p2) target bundleno = 204 (0xcc), region = 24  ;;  %s178_s5 = scalar_lea.sflag (!%p172_p2), [#allocation3], %s1066_s25 }
  0x34   : > { %s764_s30 = smul.u32 (!%p172_p2), 192, %s1066_s25 }
  0x36   : > { %s1070_s6 = scalar_lea.vmem (!%p172_p2), [#allocation2], %s764_s30 }
  0x38   : > { %936 = dma.done.wait (%p1028_p6), %s178_s5, 3072  }
  0x39   : > { %938 = vsyncadd (%p1028_p6), %s178_s5, 4294964224  ;;  %v1077_v0 = vld [vmem:[%s1070_s6] sm:$0xff]  ;;  %v733_v13 = vld [vmem:[%s1070_s6 + $0x68] sm:$0xff]  ;;  %s722_s19 = sshll.u32 %s1066_s25, 5  ;;  %s553_s7 = scalar_lea.sflag [#allocation4], %s1066_s25 }
  0x3a   : > { %v732_v1 = vld [vmem:[%s1070_s6 + $0x60] sm:$0xff]  ;;  %v444_v9 = vsub.f32 -1.0, %v1077_v0  ;;  %v452_v12 = vsub.f32 1.0, %v1077_v0  ;;  %v737_v14 = vld [vmem:[%s1070_s6 + $0x88] sm:$0xff]  ;;  %v1110_v25 = vadd.f32 1e-06, %v733_v13 }
  0x3b   : > { %v736_v2 = vld [vmem:[%s1070_s6 + $0x80] sm:$0xff]  ;;  %v252_v4 = vadd.f32 1e-06, %v732_v1  ;;  %v741_v22 = vld [vmem:[%s1070_s6 + $0xa8] sm:$0xff]  ;;  %v1112_v26 = vadd.f32 1e-06, %v737_v14 }
  0x3c   : > { %v740_v3 = vld [vmem:[%s1070_s6 + $0xa0] sm:$0xff]  ;;  %v1082_v5 = vadd.f32 1e-06, %v736_v2  ;;  %v1108_v24 = vld [vmem:[%s1070_s6 + $0x8] sm:$0xff]  ;;  %v1125_v33 = vadd.f32 1e-06, %v741_v22  ;;  %vm276_vm6 = vweird.f32 %v1110_v25 }
  0x3d   : > { %v1084_v6 = vadd.f32 1e-06, %v740_v3  ;;  %v1087_v7 = vld [vmem:[%s1070_s6 + $0x20] sm:$0xff]  ;;  %817 = vrcp.f32 %v252_v4  ;;  %v265_v10 = vand.u32 2147483647, %v252_v4  ;;  %v267_v11 = vand.u32 2147483648, %v252_v4 }
  0x3e   : > { %v1090_v8 = vld [vmem:[%s1070_s6 + $0x40] sm:$0xff]  ;;  %819 = vrcp.f32 %v1082_v5  ;;  %v329_v15 = vand.u32 2147483647, %v1082_v5  ;;  %v331_v16 = vand.u32 2147483648, %v1082_v5  ;;  %v460_v17 = vsub.f32 -1.0, %v1087_v7  ;;  %v1143_v50 = vld [vmem:[%s1070_s6 + $0x28] sm:$0xff] }
  0x3f   : > { %821 = vrcp.f32 %v1084_v6  ;;  %v393_v18 = vand.u32 2147483647, %v1084_v6  ;;  %v395_v19 = vand.u32 2147483648, %v1084_v6  ;;  %v468_v20 = vsub.f32 1.0, %v1087_v7  ;;  %v738_v36 = vld [vmem:[%s1070_s6 + $0x90] sm:$0xff]  ;;  %s1291_s29 = scalar_lea.vmem [#allocation5], %s722_s19 }
  0x40   : > { %v476_v21 = vsub.f32 -1.0, %v1090_v8  ;;  %vm261_vm0 = vweird.f32 %v252_v4  ;;  %v484_v23 = vsub.f32 1.0, %v1090_v8  ;;  %vm1114_vm1 = vcmp.eq.f32.partialorder %v265_v10, 8.507059e+37  ;;  %s1495_s3 = scalar_lea.vmem [#allocation6], %s722_s19  ;;  %s746_s14 = sshll.u32 (%p1033_p9), %s1010_s13, 2 }
  0x41   : > { %v268_v28 = vor.u32 1.1754944e-38, %v267_v11  ;;  %vm325_vm2 = vweird.f32 %v1082_v5  ;;  %vm389_vm3 = vweird.f32 %v1084_v6  ;;  %vm1120_vm4 = vcmp.eq.f32.partialorder %v329_v15, 8.507059e+37  ;;  %s566_s16 = ssub.s32 (%p1033_p9), 9, %s746_s14 }
  0x42   : > { %v332_v31 = vor.u32 1.1754944e-38, %v331_v16  ;;  %v396_v32 = vor.u32 1.1754944e-38, %v395_v19  ;;  %823 = vrcp.f32 %v1110_v25  ;;  %vm1127_vm5 = vcmp.eq.f32.partialorder %v393_v18, 8.507059e+37  ;;  %p567_p3 = scmp.lt.s32.totalorder (%p1033_p9), %s566_s16, 4 }
  0x43   : > { %v818_v29 = vpop.eup %817  ;;  %825 = vrcp.f32 %v1112_v26  ;;  %v445_v37 = vsub.f32 -1.0, %v1108_v24  ;;  %v453_v38 = vsub.f32 1.0, %v1108_v24  ;;  %v280_v41 = vand.u32 2147483647, %v1110_v25 }
  0x44   : > { %v820_v34 = vpop.eup %819  ;;  %v257_v35 = vmul.f32 %v818_v29, %v252_v4  ;;  %v282_v42 = vand.u32 2147483648, %v1110_v25  ;;  %vm262_vm7 = vweird.f32 %v818_v29  ;;  %v344_v45 = vand.u32 2147483647, %v1112_v26 }
  0x45   : > { %v822_v39 = vpop.eup %821  ;;  %v321_v40 = vmul.f32 %v820_v34, %v1082_v5  ;;  %vm326_vm8 = vweird.f32 %v820_v34  ;;  %vm340_vm9 = vweird.f32 %v1112_v26  ;;  %v346_v47 = vand.u32 2147483648, %v1112_v26  ;;  %vm1147_vm11 = vmor %vm261_vm0, %vm262_vm7 }
  0x46   : > { %v258_v43 = vsub.f32 1.0, %v257_v35  ;;  %v385_v44 = vmul.f32 %v822_v39, %v1084_v6  ;;  %vm390_vm10 = vweird.f32 %v822_v39  ;;  %827 = vrcp.f32 %v1125_v33  ;;  %vm1159_vm13 = vmor %vm325_vm2, %vm326_vm8 }
  0x47   : > { %v322_v46 = vsub.f32 1.0, %v321_v40  ;;  %vm1151_vm12 = vcmp.eq.f32.partialorder %v280_v41, 8.507059e+37  ;;  %v283_v55 = vor.u32 1.1754944e-38, %v282_v42  ;;  %v408_v56 = vand.u32 2147483647, %v1125_v33  ;;  %vm1171_vm15 = vmor %vm389_vm3, %vm390_vm10 }
  0x48   : > { %v259_v48 = vmul.f32 %v818_v29, %v258_v43  ;;  %v386_v49 = vsub.f32 1.0, %v385_v44  ;;  %v824_v51 = vpop.eup %823  ;;  %vm1164_vm14 = vcmp.eq.f32.partialorder %v344_v45, 8.507059e+37  ;;  %v347_v63 = vor.u32 1.1754944e-38, %v346_v47 }
  0x49   : > { %v323_v53 = vmul.f32 %v820_v34, %v322_v46  ;;  %v826_v57 = vpop.eup %825  ;;  %v272_v61 = vmul.f32 %v824_v51, %v1110_v25  ;;  %vm404_vm0 = vweird.f32 %v1125_v33  ;;  %v410_v4 = vand.u32 2147483648, %v1125_v33 }
  0x4a   : > { %v260_v58 = vadd.f32 %v818_v29, %v259_v48  ;;  %v387_v60 = vmul.f32 %v822_v39, %v386_v49  ;;  %v336_v3 = vmul.f32 %v826_v57, %v1112_v26  ;;  %v461_v5 = vsub.f32 -1.0, %v1143_v50  ;;  %v742_v48 = vld [vmem:[%s1070_s6 + $0xb0] sm:$0xff] }
  0x4b   : > { %v324_v1 = vadd.f32 %v820_v34, %v323_v53  ;;  %v273_v13 = vsub.f32 1.0, %v272_v61  ;;  %vm277_vm2 = vweird.f32 %v824_v51  ;;  %vm341_vm3 = vweird.f32 %v826_v57 }
  0x4c   : > { %v264_v10 = vsel %vm1147_vm11, %v818_v29, %v260_v58  ;;  %v388_v11 = vadd.f32 %v822_v39, %v387_v60  ;;  %v337_v15 = vsub.f32 1.0, %v336_v3  ;;  %v828_v16 = vpop.eup %827  ;;  %v411_v35 = vor.u32 1.1754944e-38, %v410_v4 }
  0x4d   : > { %v269_v6 = vsel %vm1114_vm1, %v268_v28, %v264_v10  ;;  %v328_v14 = vsel %vm1159_vm13, %v820_v34, %v324_v1  ;;  %vm1207_vm1 = vcmp.eq.f32.partialorder %v408_v56, 8.507059e+37  ;;  %v729_v34 = vld [vmem:[%s1070_s6 + $0x48] sm:$0xff]  ;;  %v400_v25 = vmul.f32 %v828_v16, %v1125_v33  ;;  %v225_v10 = vld [vmem:[%s1070_s6 + $0x10] sm:$0xff] }
  0x4e   : > { %v333_v18 = vsel %vm1120_vm4, %v332_v31, %v328_v14  ;;  %v392_v19 = vsel %vm1171_vm15, %v822_v39, %v388_v11  ;;  %v1191_v22 = vmul.f32 %v444_v9, %v269_v6  ;;  %v1195_v27 = vmul.f32 %v452_v12, %v269_v6  ;;  %vm1224_vm4 = vmor %vm276_vm6, %vm277_vm2 }
  0x4f   : > { %v397_v28 = vsel %vm1127_vm5, %v396_v32, %v392_v19  ;;  %v1201_v29 = vmul.f32 %v460_v17, %v333_v18  ;;  %v1205_v30 = vmul.f32 %v468_v20, %v333_v18  ;;  %v274_v31 = vmul.f32 %v824_v51, %v273_v13  ;;  %v734_v32 = vld [vmem:[%s1070_s6 + $0x70] sm:$0xff]  ;;  %vm1235_vm5 = vmor %vm340_vm9, %vm341_vm3 }
  0x50   : > { %v1213_v0 = vmul.f32 %v476_v21, %v397_v28  ;;  %v1217_v12 = vmul.f32 %v484_v23, %v397_v28  ;;  %v492_v7 = vmin.f32 %v1191_v22, %v1195_v27  ;;  %v338_v20 = vmul.f32 %v826_v57, %v337_v15 }
  0x51   : > { %v496_v21 = vmin.f32 %v1201_v29, %v1205_v30  ;;  %v275_v8 = vadd.f32 %v824_v51, %v274_v31  ;;  %vm405_vm6 = vweird.f32 %v828_v16  ;;  %v469_v41 = vsub.f32 1.0, %v1143_v50  ;;  %v735_v31 = vld [vmem:[%s1070_s6 + $0x78] sm:$0xff] }
  0x52   : > { %v504_v39 = vmin.f32 %v1213_v0, %v1217_v12  ;;  %v339_v40 = vadd.f32 %v826_v57, %v338_v20  ;;  %v401_v43 = vsub.f32 1.0, %v400_v25  ;;  %v1247_v44 = vadd.f32 1e-06, %v734_v32  ;;  %vm1267_vm7 = vmor %vm404_vm0, %vm405_vm6  ;;  %v739_v20 = vld [vmem:[%s1070_s6 + $0x98] sm:$0xff] }
  0x53   : > { %v500_v42 = vmax.f32 %v492_v7, %v496_v21  ;;  %v279_v26 = vsel %vm1224_vm4, %v824_v51, %v275_v8  ;;  %v477_v47 = vsub.f32 -1.0, %v729_v34  ;;  %v1254_v49 = vadd.f32 1e-06, %v738_v36  ;;  %v1331_v21 = vld [vmem:[%s1070_s6 + $0x50] sm:$0xff] }
  0x54   : > { %v284_v45 = vsel %vm1151_vm12, %v283_v55, %v279_v26  ;;  %v343_v46 = vsel %vm1235_vm5, %v826_v57, %v339_v40  ;;  %v402_v51 = vmul.f32 %v828_v16, %v401_v43  ;;  %829 = vrcp.f32 %v1247_v44 }
  0x55   : > { %v1256_v52 = vmax.f32 %v500_v42, %v504_v39  ;;  %v348_v50 = vsel %vm1164_vm14, %v347_v63, %v343_v46  ;;  %v1262_v53 = vmul.f32 %v445_v37, %v284_v45  ;;  %v1273_v55 = vmul.f32 %v453_v38, %v284_v45  ;;  %v727_v45 = vld [vmem:[%s1070_s6 + $0x38] sm:$0xff] }
  0x56   : > { %v1275_v56 = vmul.f32 %v461_v5, %v348_v50  ;;  %v1277_v57 = vmul.f32 %v469_v41, %v348_v50  ;;  %v403_v58 = vadd.f32 %v828_v16, %v402_v51  ;;  %v485_v59 = vsub.f32 1.0, %v729_v34 }
  0x57   : > { %v532_v37 = vmax.f32 %v1256_v52, 0.05  ;;  %v1281_v60 = vadd.f32 1e-06, %v742_v48  ;;  %v493_v33 = vmin.f32 %v1262_v53, %v1273_v55  ;;  %v295_v38 = vand.u32 2147483647, %v1247_v44 }
  0x58   : > { %v497_v24 = vmin.f32 %v1275_v56, %v1277_v57  ;;  %831 = vrcp.f32 %v1254_v49  ;;  %v407_v61 = vsel %vm1267_vm7, %v828_v16, %v403_v58  ;;  %v297_v62 = vand.u32 2147483648, %v1247_v44  ;;  %v726_v16 = vld [vmem:[%s1070_s6 + $0x30] sm:$0xff] }
  0x59   : > { %544 = vst [vmem:[%s1291_s29] sm:$0xff] %v532_v37  ;;  %v359_v63 = vand.u32 2147483647, %v1254_v49  ;;  %v412_v1 = vsel %vm1207_vm1, %v411_v35, %v407_v61  ;;  %vm291_vm8 = vweird.f32 %v1247_v44  ;;  %v361_v2 = vand.u32 2147483648, %v1254_v49 }
  0x5a   : > { %v1304_v3 = vmul.f32 %v477_v47, %v412_v1  ;;  %v1306_v4 = vmul.f32 %v485_v59, %v412_v1  ;;  %v501_v5 = vmax.f32 %v493_v33, %v497_v24  ;;  %833 = vrcp.f32 %v1281_v60  ;;  %v830_v11 = vpop.eup %829  ;;  %v743_v59 = vld [vmem:[%s1070_s6 + $0xb8] sm:$0xff] }
  0x5b   : > { %vm1310_vm9 = vcmp.eq.f32.partialorder %v295_v38, 8.507059e+37  ;;  %vm355_vm10 = vweird.f32 %v1254_v49  ;;  %v423_v6 = vand.u32 2147483647, %v1281_v60  ;;  %v425_v14 = vand.u32 2147483648, %v1281_v60 }
  0x5c   : > { %v505_v15 = vmin.f32 %v1304_v3, %v1306_v4  ;;  %v287_v18 = vmul.f32 %v830_v11, %v1247_v44  ;;  %v298_v19 = vor.u32 1.1754944e-38, %v297_v62  ;;  %vm1321_vm11 = vcmp.eq.f32.partialorder %v359_v63, 8.507059e+37 }
  0x5d   : > { %vm292_vm12 = vweird.f32 %v830_v11  ;;  %v362_v7 = vor.u32 1.1754944e-38, %v361_v2  ;;  %vm419_vm13 = vweird.f32 %v1281_v60  ;;  %v446_v17 = vsub.f32 -1.0, %v225_v10 }
  0x5e   : > { %v832_v9 = vpop.eup %831  ;;  %v1328_v32 = vmax.f32 %v501_v5, %v505_v15  ;;  %v288_v34 = vsub.f32 1.0, %v287_v18  ;;  %v426_v23 = vor.u32 1.1754944e-38, %v425_v14  ;;  %vm1334_vm15 = vcmp.eq.f32.partialorder %v423_v6, 8.507059e+37  ;;  %vm1346_vm0 = vmor %vm291_vm8, %vm292_vm12 }
  0x5f   : > { %v351_v8 = vmul.f32 %v832_v9, %v1254_v49  ;;  %vm356_vm14 = vweird.f32 %v832_v9  ;;  %v454_v35 = vsub.f32 1.0, %v225_v10  ;;  %v462_v36 = vsub.f32 -1.0, %v726_v16 }
  0x60   : > { %v1338_v39 = vadd.f32 1e-06, %v735_v31  ;;  %v834_v40 = vpop.eup %833  ;;  %v533_v41 = vmax.f32 %v1328_v32, 0.05  ;;  %v289_v42 = vmul.f32 %v830_v11, %v288_v34  ;;  %v1341_v43 = vadd.f32 1e-06, %v739_v20  ;;  %vm1360_vm3 = vmor %vm355_vm10, %vm356_vm14 }
  0x61   : > { %v352_v26 = vsub.f32 1.0, %v351_v8  ;;  %v415_v46 = vmul.f32 %v834_v40, %v1281_v60  ;;  %v470_v47 = vsub.f32 1.0, %v726_v16  ;;  %v478_v48 = vsub.f32 -1.0, %v1331_v21  ;;  %v226_v8 = vld [vmem:[%s1070_s6 + $0x18] sm:$0xff] }
  0x62   : > { %835 = vrcp.f32 %v1338_v39  ;;  %545 = vst [vmem:[%s1291_s29 + $0x8] sm:$0xff] %v533_v41  ;;  %v290_v50 = vadd.f32 %v830_v11, %v289_v42  ;;  %vm420_vm2 = vweird.f32 %v834_v40  ;;  %v486_v54 = vsub.f32 1.0, %v1331_v21 }
  0x63   : > { %v353_v51 = vmul.f32 %v832_v9, %v352_v26  ;;  %v416_v58 = vsub.f32 1.0, %v415_v46  ;;  %v310_v33 = vand.u32 2147483647, %v1338_v39  ;;  %v312_v24 = vand.u32 2147483648, %v1338_v39  ;;  %vm1381_vm5 = vmor %vm419_vm13, %vm420_vm2 }
  0x64   : > { %837 = vrcp.f32 %v1341_v43  ;;  %v294_v38 = vsel %vm1346_vm0, %v830_v11, %v290_v50  ;;  %vm306_vm1 = vweird.f32 %v1338_v39  ;;  %v374_v49 = vand.u32 2147483647, %v1341_v43 }
  0x65   : > { %v354_v61 = vadd.f32 %v832_v9, %v353_v51  ;;  %v299_v62 = vsel %vm1310_vm9, %v298_v19, %v294_v38  ;;  %v417_v63 = vmul.f32 %v834_v40, %v416_v58  ;;  %vm370_vm4 = vweird.f32 %v1341_v43 }
  0x66   : > { %v376_v1 = vand.u32 2147483648, %v1341_v43  ;;  %v1385_v10 = vmul.f32 %v446_v17, %v299_v62  ;;  %v1387_v11 = vmul.f32 %v454_v35, %v299_v62  ;;  %v1389_v13 = vadd.f32 1e-06, %v743_v59 }
  0x67   : > { %v358_v2 = vsel %vm1360_vm3, %v832_v9, %v354_v61  ;;  %v418_v15 = vadd.f32 %v834_v40, %v417_v63  ;;  %vm1393_vm6 = vcmp.eq.f32.partialorder %v310_v33, 8.507059e+37  ;;  %v313_v60 = vor.u32 1.1754944e-38, %v312_v24 }
  0x68   : > { %v836_v6 = vpop.eup %835  ;;  %v363_v14 = vsel %vm1321_vm11, %v362_v7, %v358_v2  ;;  %v494_v31 = vmin.f32 %v1385_v10, %v1387_v11  ;;  %vm1404_vm7 = vcmp.eq.f32.partialorder %v374_v49, 8.507059e+37  ;;  %v377_v20 = vor.u32 1.1754944e-38, %v376_v1 }
  0x69   : > { %v1397_v18 = vmul.f32 %v462_v36, %v363_v14  ;;  %v1399_v19 = vmul.f32 %v470_v47, %v363_v14  ;;  %v302_v9 = vmul.f32 %v836_v6, %v1338_v39  ;;  %v422_v17 = vsel %vm1381_vm5, %v834_v40, %v418_v15  ;;  %v1424_v47 = vld [vmem:[%s1070_s6 + $0x58] sm:$0xff] }
  0x6a   : > { %v838_v7 = vpop.eup %837  ;;  %vm307_vm8 = vweird.f32 %v836_v6  ;;  %839 = vrcp.f32 %v1389_v13  ;;  %v427_v21 = vsel %vm1334_vm15, %v426_v23, %v422_v17  ;;  %v438_v40 = vand.u32 2147483647, %v1389_v13 }
  0x6b   : > { %v498_v34 = vmin.f32 %v1397_v18, %v1399_v19  ;;  %v303_v35 = vsub.f32 1.0, %v302_v9  ;;  %v366_v36 = vmul.f32 %v838_v7, %v1341_v43  ;;  %v1417_v42 = vmul.f32 %v478_v48, %v427_v21  ;;  %vm1432_vm10 = vmor %vm306_vm1, %vm307_vm8 }
  0x6c   : > { %v1419_v26 = vmul.f32 %v486_v54, %v427_v21  ;;  %vm371_vm9 = vweird.f32 %v838_v7  ;;  %v440_v50 = vand.u32 2147483648, %v1389_v13  ;;  %vm434_vm11 = vweird.f32 %v1389_v13 }
  0x6d   : > { %v502_v46 = vmax.f32 %v494_v31, %v498_v34  ;;  %v304_v25 = vmul.f32 %v836_v6, %v303_v35  ;;  %v367_v23 = vsub.f32 1.0, %v366_v36  ;;  %v447_v54 = vsub.f32 -1.0, %v226_v8  ;;  %vm1444_vm13 = vmor %vm370_vm4, %vm371_vm9 }
  0x6e   : > { %v506_v51 = vmin.f32 %v1417_v42, %v1419_v26  ;;  %v455_v44 = vsub.f32 1.0, %v226_v8  ;;  %vm1437_vm12 = vcmp.eq.f32.partialorder %v438_v40, 8.507059e+37  ;;  %v441_v24 = vor.u32 1.1754944e-38, %v440_v50 }
  0x6f   : > { %v305_v58 = vadd.f32 %v836_v6, %v304_v25  ;;  %v368_v59 = vmul.f32 %v838_v7, %v367_v23  ;;  %v463_v38 = vsub.f32 -1.0, %v727_v45  ;;  %v471_v62 = vsub.f32 1.0, %v727_v45 }
  0x70   : > { %v840_v61 = vpop.eup %839  ;;  %v510_v49 = vmax.f32 %v502_v46, %v506_v51  ;;  %v479_v63 = vsub.f32 -1.0, %v1424_v47  ;;  %v512_v1 = vmax.f32 %v1191_v22, %v1195_v27  ;;  %v516_v31 = vmax.f32 %v1201_v29, %v1205_v30 }
  0x71   : > { %v309_v2 = vsel %vm1432_vm10, %v836_v6, %v305_v58  ;;  %v369_v5 = vadd.f32 %v838_v7, %v368_v59  ;;  %v430_v14 = vmul.f32 %v840_v61, %v1389_v13  ;;  %vm435_vm14 = vweird.f32 %v840_v61 }
  0x72   : > { %v534_v15 = vmax.f32 %v510_v49, 0.05  ;;  %v314_v43 = vsel %vm1393_vm6, %v313_v60, %v309_v2  ;;  %v524_v9 = vmax.f32 %v1213_v0, %v1217_v12  ;;  %v520_v34 = vmin.f32 %v512_v1, %v516_v31  ;;  %vm1473_vm15 = vmor %vm434_vm11, %vm435_vm14 }
  0x73   : > { %v373_v22 = vsel %vm1444_vm13, %v838_v7, %v369_v5  ;;  %v431_v27 = vsub.f32 1.0, %v430_v14  ;;  %v451_v17 = vmul.f32 %v447_v54, %v314_v43  ;;  %v459_v6 = vmul.f32 %v455_v44, %v314_v43 }
  0x74   : > { %546 = vst [vmem:[%s1291_s29 + $0x10] sm:$0xff] %v534_v15  ;;  %v378_v21 = vsel %vm1404_vm7, %v377_v20, %v373_v22  ;;  %v536_v16 = vadd.f32 1e-06, %v532_v37  ;;  %v513_v29 = vmax.f32 %v1262_v53, %v1273_v55  ;;  %v487_v12 = vsub.f32 1.0, %v1424_v47 }
  0x75   : > { %v432_v30 = vmul.f32 %v840_v61, %v431_v27  ;;  %v467_v60 = vmul.f32 %v463_v38, %v378_v21  ;;  %v475_v0 = vmul.f32 %v471_v62, %v378_v21  ;;  %v495_v28 = vmin.f32 %v451_v17, %v459_v6 }
  0x76   : > { %v528_v20 = vmin.f32 %v520_v34, %v524_v9  ;;  %v517_v52 = vmax.f32 %v1275_v56, %v1277_v57  ;;  %v525_v53 = vmax.f32 %v1304_v3, %v1306_v4  ;;  %v514_v8 = vmax.f32 %v1385_v10, %v1387_v11 }
  0x77   : > { %v433_v55 = vadd.f32 %v840_v61, %v432_v30  ;;  %v499_v37 = vmin.f32 %v467_v60, %v475_v0  ;;  %v518_v13 = vmax.f32 %v1397_v18, %v1399_v19  ;;  %v537_v45 = vadd.f32 1e-06, %v533_v41 }
  0x78   : > { %v540_v35 = vmax.f32 %v528_v20, %v536_v16  ;;  %v521_v36 = vmin.f32 %v513_v29, %v517_v52  ;;  %v526_v40 = vmax.f32 %v1417_v42, %v1419_v26  ;;  %v538_v3 = vadd.f32 1e-06, %v534_v15 }
  0x79   : > { %v437_v56 = vsel %vm1473_vm15, %v840_v61, %v433_v55  ;;  %v522_v57 = vmin.f32 %v514_v8, %v518_v13  ;;  %v515_v4 = vmax.f32 %v451_v17, %v459_v6  ;;  %v519_v41 = vmax.f32 %v467_v60, %v475_v0 }
  0x7a   : > { %v442_v10 = vsel %vm1437_vm12, %v441_v24, %v437_v56  ;;  %548 = vst [vmem:[%s1495_s3] sm:$0xff] %v540_v35  ;;  %v529_v32 = vmin.f32 %v521_v36, %v525_v53  ;;  %v503_v19 = vmax.f32 %v495_v28, %v499_v37 }
  0x7b   : > { %v483_v11 = vmul.f32 %v479_v63, %v442_v10  ;;  %v491_v18 = vmul.f32 %v487_v12, %v442_v10  ;;  %v530_v42 = vmin.f32 %v522_v57, %v526_v40  ;;  %v523_v25 = vmin.f32 %v515_v4, %v519_v41 }
  0x7c   : > { %v541_v26 = vmax.f32 %v529_v32, %v537_v45 }
  0x7d   : > { %v507_v46 = vmin.f32 %v483_v11, %v491_v18  ;;  %v542_v47 = vmax.f32 %v530_v42, %v538_v3  ;;  %v527_v23 = vmax.f32 %v483_v11, %v491_v18 }
  0x7e   : > { %549 = vst [vmem:[%s1495_s3 + $0x8] sm:$0xff] %v541_v26 }
  0x7f   : > { %v511_v50 = vmax.f32 %v503_v19, %v507_v46  ;;  %550 = vst [vmem:[%s1495_s3 + $0x10] sm:$0xff] %v542_v47  ;;  %v531_v48 = vmin.f32 %v523_v25, %v527_v23 }
  0x81   : > { %v535_v51 = vmax.f32 %v511_v50, 0.05 }
  0x83   : > { %547 = vst [vmem:[%s1291_s29 + $0x18] sm:$0xff] %v535_v51  ;;  %v539_v54 = vadd.f32 1e-06, %v535_v51  ;;  %564 = sbr.rel (!%p1033_p9) target bundleno = 167 (0xa7), region = 32 }
  0x85   : > { %v543_v44 = vmax.f32 %v531_v48, %v539_v54 }
  0x87   : > { %551 = vst [vmem:[%s1495_s3 + $0x18] sm:$0xff] %v543_v44 }
  0x88   : > { %s1675_s16 = smov (!%p567_p3, %s566_s16), 4 }
  0x89   : > { %s747_s17 = sshll.u32 %s1675_s16, 3 }
  0x8a   : > { %s570_s22 = ssub.s32 32, %s747_s17 }
  0x8b   : > { %s571_s23 = sshll.u32 %s570_s22, 4 }
  0x8c   : > { %572 = vsyncadd %s553_s7, %s571_s23  ;;  %p1512_p4 = scmp.ne.s32.totalorder %s747_s17, 0  ;;  %s761_s26 = sshll.u32 %s1010_s13, 5 }
  0x8d   : > { %s575_s4 = scalar_lea.hbm %s1610_s1, %s761_s26  ;;  %s577_s30 = sshll.u32 %s1291_s29, 4  ;;  %s1521_s30 = int_to_ptr.vmem [resolvable:$true] %s577_s30 }
  0x8e   : > { %s579_s5 = sshll.u32 %s575_s4, 4  ;;  %s751_s6 = sshll.u32 %s1675_s16, 7  ;;  %s1523_s5 = int_to_ptr.hbm [resolvable:$true] %s579_s5 }
  0x8f   : > { %s841_s19 = sshra.s32 %s1521_s30, 4  ;;  %s843_s14 = sshrl.u32 %s751_s6, 4  ;;  %s842_s19 = int_to_ptr.vmem [resolvable:$true] %s841_s19 }
  0x90   : > { %s848_s17 = scalar_lea.vmem %s842_s19, %s843_s14  ;;  %s968_s22 = smov [#allocation5]  }
  0x91   : > { %p849_p5 = scmp.ne.s32.totalorder %s842_s19, %s848_s17  ;;  %s852_s23 = scalar_lea.vmem %s968_s22, 64 }
  0x92   : > { %p854_p8 = scmp.lt.s32.totalorder %s852_s23, %s848_s17 }
  0x93   : > { %p850_p6 = pnand %p849_p5, %p1512_p4 }
  0x95   : > { %p851_p7 = pneg %p850_p6 }
  0x97   : > { %p856_p11 = pnand %p854_p8, %p851_p7 }
  0x99   : > { %859 = shalt.err (!%p856_p11)
}
  0x9a   : > { %s860_s29 = sshra.s32 %s1523_s5, 4  ;;  %s871_s4 = scalar_lea.hbm %s1610_s1, 72  ;;  %s861_s29 = int_to_ptr.hbm [resolvable:$true] %s860_s29 }
  0x9b   : > { %s867_s26 = scalar_lea.hbm %s861_s29, %s843_s14  ;;  %p872_p1 = scmp.lt.s32.totalorder %s861_s29, %s1610_s1 }
  0x9c   : > { %p868_p12 = scmp.ne.s32.totalorder %s861_s29, %s867_s26  ;;  %p873_p2 = scmp.lt.s32.totalorder %s871_s4, %s867_s26 }
  0x9e   : > { %p869_p13 = pnand %p868_p12, %p1512_p4  ;;  %p874_p3 = por %p873_p2, %p872_p1 }
  0xa0   : > { %p870_p0 = pneg %p869_p13 }
  0xa2   : > { %p875_p5 = pnand %p874_p3, %p870_p0 }
  0xa4   : > { %878 = shalt.err (!%p875_p5)
}
  0xa5   : > { %s969_s17 = smov 128   ;;  %s970_s14 = smov 8  }
  0xa6   : > { %585 = dma.vmem_to_hbm [thread:$0]  (%p1512_p4), %s1521_s30, %s751_s6, %s1523_s5, %s553_s7, %s969_s17, %s969_s17, %s970_s14  }
  0xa7 PF: > { %588 = sbr.rel (!%p1033_p9) target bundleno = 204 (0xcc), region = 36  ;;  %s752_s8 = sshll.u32 (%p1033_p9), %s1010_s13, 2 }
  0xa8   : > { %s590_s22 = ssub.s32 (%p1033_p9), 9, %s752_s8  ;;  %s1665_s27 = scalar_lea.sflag (%p1033_p9), [#allocation7], %s1066_s25 }
  0xa9   : > { %p591_p6 = scmp.lt.s32.totalorder (%p1033_p9), %s590_s22, 4 }
  0xac   : > { %s1677_s22 = smov (!%p591_p6, %s590_s22), 4 }
  0xad   : > { %s753_s23 = sshll.u32 %s1677_s22, 3 }
  0xae   : > { %s594_s29 = ssub.s32 32, %s753_s23 }
  0xaf   : > { %s595_s26 = sshll.u32 %s594_s29, 4 }
  0xb0   : > { %596 = vsyncadd %s1665_s27, %s595_s26  ;;  %p1556_p4 = scmp.ne.s32.totalorder %s753_s23, 0  ;;  %s762_s7 = sshll.u32 %s1010_s13, 5 }
  0xb1   : > { %s599_s30 = scalar_lea.hbm %s1611_s2, %s762_s7  ;;  %s601_s5 = sshll.u32 %s1495_s3, 4  ;;  %s1565_s5 = int_to_ptr.vmem [resolvable:$true] %s601_s5 }
  0xb2   : > { %s603_s6 = sshll.u32 %s599_s30, 4  ;;  %s757_s28 = sshll.u32 %s1677_s22, 7  ;;  %s1567_s6 = int_to_ptr.hbm [resolvable:$true] %s603_s6 }
  0xb3   : > { %s880_s4 = sshra.s32 %s1565_s5, 4  ;;  %s882_s19 = sshrl.u32 %s757_s28, 4  ;;  %s881_s4 = int_to_ptr.vmem [resolvable:$true] %s880_s4 }
  0xb4   : > { %s887_s17 = scalar_lea.vmem %s881_s4, %s882_s19  ;;  %s971_s13 = smov [#allocation6]  }
  0xb5   : > { %p888_p9 = scmp.ne.s32.totalorder %s881_s4, %s887_s17  ;;  %s891_s14 = scalar_lea.vmem %s971_s13, 64 }
  0xb6   : > { %p893_p11 = scmp.lt.s32.totalorder %s891_s14, %s887_s17 }
  0xb7   : > { %p889_p7 = pnand %p888_p9, %p1556_p4 }
  0xb9   : > { %p890_p8 = pneg %p889_p7 }
  0xbb   : > { %p895_p12 = pnand %p893_p11, %p890_p8 }
  0xbd   : > { %898 = shalt.err (!%p895_p12)
}
  0xbe   : > { %s899_s3 = sshra.s32 %s1567_s6, 4  ;;  %s910_s26 = scalar_lea.hbm %s1611_s2, 72  ;;  %s900_s3 = int_to_ptr.hbm [resolvable:$true] %s899_s3 }
  0xbf   : > { %s906_s8 = scalar_lea.hbm %s900_s3, %s882_s19  ;;  %p911_p2 = scmp.lt.s32.totalorder %s900_s3, %s1611_s2 }
  0xc0   : > { %p907_p13 = scmp.ne.s32.totalorder %s900_s3, %s906_s8  ;;  %p912_p3 = scmp.lt.s32.totalorder %s910_s26, %s906_s8 }
  0xc2   : > { %p908_p0 = pnand %p907_p13, %p1556_p4  ;;  %p913_p5 = por %p912_p3, %p911_p2 }
  0xc4   : > { %p909_p1 = pneg %p908_p0 }
  0xc6   : > { %p914_p6 = pnand %p913_p5, %p909_p1 }
  0xc8   : > { %917 = shalt.err (!%p914_p6)
}
  0xc9   : > { %s972_s16 = smov 128   ;;  %s973_s24 = smov 8  }
  0xca   : > { %s1667_s30 = scalar_lea.sflag [#allocation7], %s1066_s25 }
  0xcb   : > { %609 = dma.vmem_to_hbm [thread:$0]  (%p1556_p4), %s1565_s5, %s757_s28, %s1567_s6, %s1667_s30, %s972_s16, %s972_s16, %s973_s24  }
  0xcc PF: > { %p775_p9 = scmp.ge.s32.totalorder %s961_s12, 2  ;;  %s618_s4 = sand.u32 1, %s949_s9  }
  0xcd   : > { %s619_s19 = scalar_lea.sflag [#allocation4], %s618_s4 }
  0xce   : > { %p769_p7 = pnand %p775_p9, %p1037_p10 }
  0xd0   : > { %p770_p8 = pneg %p769_p7 }
  0xd2   : > { %940 = dma.done.wait (%p770_p8), %s619_s19, 512  }
  0xd3   : > { %942 = vsyncadd (%p770_p8), %s619_s19, 4294966784  ;;  %s629_s17 = scalar_lea.sflag [#allocation7], %s618_s4 }
  0xd4   : > { %944 = dma.done.wait (%p770_p8), %s629_s17, 512  }
  0xd5   : > { %946 = vsyncadd (%p770_p8), %s629_s17, 4294966784  ;;  %p19_p4 = scmp.ge.s32.totalorder %s1014_s15, 5   ;;  %s1668_s9 = smov %s953_s10 }
  0xd6   : > { %s1669_s10 = smov %s957_s11  ;;  %s1670_s11 = smov %s1026_s18 }
  0xd7   : > { %s1671_s12 = smov %s1014_s15  ;;  %21 = sbr.rel (!%p19_p4) target bundleno = 7 (0x7), region = 96 }
  0xdc   :  { %635 = vsyncpa [#allocation3], 1 }
  0xdd   :  { %637 = vsyncpa [#allocation3 + $0x1], 1 }
  0xde   :  { %638 = vsyncpa [#allocation4], 1 }
  0xdf   :  { %640 = vsyncpa [#allocation4 + $0x1], 1 }
  0xe0   :  { %641 = vsyncpa [#allocation7], 1 }
  0xe1   :  { %643 = vsyncpa [#allocation7 + $0x1], 1 }

</bundles_post_ra>
